<compile_context>
chip_gen: v6e
topology: v6e:2x2x1
jax: 0.10.0
libtpu: 0.0.40
codegen_flags: <defaults>
</compile_context>

<pallas_src>
import functools

import jax
import jax.numpy as jnp
import numpy as np
from jax import lax
from jax.experimental import pallas as pl
from jax.experimental.pallas import tpu as pltpu


@functools.lru_cache(maxsize=None)
def _tpu_roll_supported() -> bool:
    """Probe pltpu.roll once (availability + jnp.roll sign convention)."""
    def _k(x_ref, o_ref):
        o_ref[...] = pltpu.roll(x_ref[...], 1, axis=1)
    try:
        x = jnp.arange(8 * 128, dtype=jnp.float32).reshape(8, 128)
        out = pl.pallas_call(
            _k, out_shape=jax.ShapeDtypeStruct((8, 128), jnp.float32))(x)
        out = jax.block_until_ready(out)
        return bool(jnp.array_equal(out, jnp.roll(x, 1, axis=1)))
    except Exception:
        return False


def _lane_shift_left(x, s, use_roll):
    """result[..., p] = x[..., (p + s) % P]; wrapped lanes are masked by caller."""
    P = x.shape[-1]
    s = s % P
    if s == 0:
        return x
    if use_roll:
        # pltpu.roll: result[p] = x[(p - shift) % P]  ->  shift = (-s) % P.
        return pltpu.roll(x, (P - s) % P, axis=x.ndim - 1)
    # Fallback (interpret / no roll support): two lane slices + concat.
    return jnp.concatenate([x[..., s:], x[..., :s]], axis=-1)


def _resnet_block_kernel(x_ref, w_ref, mask_ref, o_ref, patch_ref, *, W, use_roll):
    # x_ref:     (Nb, C, P)  block of Nb samples; channels on sublanes, H*W on lanes
    # w_ref:     (C, 9*C)    im2col-packed weights, w_ref[o, k*C+i] = w[o,i,ky,kx], k=ky*3+kx
    # mask_ref:  (9, 1, P)   per-tap boundary masks (1.0 = in-image source pixel)
    # o_ref:     (Nb, C, P)
    # patch_ref: (9*C, Nb*P) VMEM scratch: im2col patch for the whole sample block
    Nb, C, P = x_ref.shape
    x = x_ref[...].astype(jnp.float32)          # also the residual

    # --- im2col: 9 lane-rotated, boundary-masked taps written directly into the
    # VMEM patch scratch at static (sublane, lane) offsets (no concatenate).
    for k in range(9):
        dy, dx = k // 3 - 1, k % 3 - 1
        shift = dy * W + dx                     # flat source offset for this tap
        m_k = mask_ref[k]                       # (1, P), broadcasts over channels
        for n in range(Nb):
            t = _lane_shift_left(x[n], shift, use_roll)          # (C, P)
            patch_ref[k * C:(k + 1) * C, n * P:(n + 1) * P] = t * m_k

    # --- 3x3 conv (stride 1, pad 1, no bias) as ONE MXU matmul for the whole
    # block: (C, 9C) @ (9C, Nb*P), batch folded onto the lane axis.
    y = jnp.dot(w_ref[...], patch_ref[...], preferred_element_type=jnp.float32)

    # --- InstanceNorm2d (affine=False, biased var, eps=1e-5) + ReLU + residual.
    # Per-sample stats via lane-aligned static slices of the fused matmul output.
    inv_p = 1.0 / P
    for n in range(Nb):
        y_n = y[:, n * P:(n + 1) * P]                                  # (C, P)
        mean = jnp.sum(y_n, axis=1, keepdims=True) * inv_p
        cen = y_n - mean
        var = jnp.sum(cen * cen, axis=1, keepdims=True) * inv_p       # two-pass
        normed = cen * lax.rsqrt(var + 1e-5)
        o_ref[n, :, :] = (x[n] + jnp.maximum(normed, 0.0)).astype(o_ref.dtype)


def resnet_block_pallas(x_nchw, w_oihw, *, samples_per_step=None, core_parallel=False):
    """ResnetBlock forward: x + relu(instance_norm(conv3x3_s1_p1(x))).

    x_nchw: (N, C, H, W) float32; w_oihw: (C, C, 3, 3) conv weight (no bias).
    samples_per_step: samples per grid step (must divide N). Default N = one
      grid step (best on single-TensorCore v5e/v6e). On v7x pass N//2 (keeps
      >=2 grid steps) and/or core_parallel=True so both TensorCores get work.
    """
    N, C, H, W = x_nchw.shape
    assert w_oihw.shape == (C, C, 3, 3)
    P = H * W
    Nb = N if samples_per_step is None else samples_per_step
    assert N % Nb == 0, "samples_per_step must divide the batch size"

    # Free reshape only (stay in NCHW order): channels -> sublanes, H*W -> lanes.
    x_flat = x_nchw.reshape(N, C, P)
    # (O, I, kh, kw) -> (O, kh, kw, I) -> (O, 9*I); flat index = k*I + i, k = ky*3+kx.
    w2 = jnp.transpose(w_oihw, (0, 2, 3, 1)).reshape(C, 9 * C)

    # Per-tap boundary masks: passed as a tiny grid-resident INPUT (fixes the
    # previous "kernel captures constants" error).
    q = np.arange(P)
    rows, cols = q // W, q % W
    mask_np = np.empty((9, 1, P), np.float32)
    for k in range(9):
        dy, dx = k // 3 - 1, k % 3 - 1
        mask_np[k, 0] = ((rows + dy >= 0) & (rows + dy < H) &
                         (cols + dx >= 0) & (cols + dx < W)).astype(np.float32)
    mask = jnp.asarray(mask_np)

    use_roll = _tpu_roll_supported()
    kernel = functools.partial(_resnet_block_kernel, W=W, use_roll=use_roll)
    # v7x: core_parallel=True shards the batch grid axis across both TensorCores.
    dim_sem = (pltpu.CORE_PARALLEL,) if core_parallel else ("parallel",)

    out_flat = pl.pallas_call(
        kernel,
        out_shape=jax.ShapeDtypeStruct((N, C, P), x_nchw.dtype),
        grid=(N // Nb,),
        in_specs=[
            pl.BlockSpec((Nb, C, P), lambda i: (i, 0, 0)),   # x block
            pl.BlockSpec((C, 9 * C), lambda i: (0, 0)),      # weights (resident)
            pl.BlockSpec((9, 1, P), lambda i: (0, 0, 0)),    # tap masks (resident)
        ],
        out_specs=pl.BlockSpec((Nb, C, P), lambda i: (i, 0, 0)),
        scratch_shapes=[pltpu.VMEM((9 * C, Nb * P), jnp.float32)],
        compiler_params=pltpu.CompilerParams(dimension_semantics=dim_sem),
    )(x_flat, w2, mask)

    return out_flat.reshape(N, C, H, W)


def _reference(x_nchw, w_oihw):
    """Pure-JAX reference: conv3x3(p=1,s=1,no bias) -> instance_norm -> relu -> +x."""
    y = lax.conv_general_dilated(
        x_nchw, w_oihw, window_strides=(1, 1), padding=((1, 1), (1, 1)),
        dimension_numbers=("NCHW", "OIHW", "NCHW"),
        precision=lax.Precision.HIGHEST,
    )
    mean = jnp.mean(y, axis=(2, 3), keepdims=True)
    var = jnp.mean((y - mean) ** 2, axis=(2, 3), keepdims=True)
    y = (y - mean) * lax.rsqrt(var + 1e-5)
    return x_nchw + jnp.maximum(y, 0.0)


if __name__ == "__main__":
    key = jax.random.PRNGKey(0)
    k_x, k_w = jax.random.split(key)

    N, C, H, W = 2, 8, 16, 16          # ResnetBlock(conv_dim=8, 'instance', 'relu')
    x = jax.random.normal(k_x, (N, C, H, W), dtype=jnp.float32)
    # Deterministic synthetic conv weights (Conv2d(conv_dim, conv_dim, 3), no bias).
    w = 0.05 * jax.random.normal(k_w, (C, C, 3, 3), dtype=jnp.float32)

    out = resnet_block_pallas(x, w)
    out = jax.block_until_ready(out)

    ref = _reference(x, w)
    assert out.shape == (N, C, H, W)
    assert jnp.allclose(out, ref, atol=2e-4, rtol=2e-4), "mismatch vs reference"

    print("KERNEL_OK")
</pallas_src>

<mosaic_0001>
module attributes {stable_mosaic.version = 11 : i64} {
  func.func @_k(%arg0: memref<8x128xf32, #tpu.memory_space<vmem>>, %arg1: memref<8x128xf32, #tpu.memory_space<vmem>>) attributes {dimension_semantics = [], scalar_prefetch = 0 : i64, scratch_operands = 0 : i64, tpu.core_type = #tpu.core_type<tc>} {
    %c0 = arith.constant 0 : index
    %c0_0 = arith.constant 0 : index
    %0 = vector.load %arg0[%c0, %c0_0] : memref<8x128xf32, #tpu.memory_space<vmem>>, vector<8x128xf32>
    %c1_i32 = arith.constant 1 : i32
    %1 = tpu.dynamic_rotate %0 by %c1_i32 dim 1 : vector<8x128xf32>, i32 -> vector<8x128xf32>
    %c0_1 = arith.constant 0 : index
    %c0_2 = arith.constant 0 : index
    %2 = vector.load %arg1[%c0_1, %c0_2] : memref<8x128xf32, #tpu.memory_space<vmem>>, vector<8x128xf32>
    tpu.vector_store %arg1[%c0_1, %c0_2], %1 {strides = array<i32>} : memref<8x128xf32, #tpu.memory_space<vmem>>, vector<8x128xf32>,
    return
  }
}

module attributes {stable_mosaic.version = 11 : i64} {
  func.func @_resnet_block_kernel(%arg0: i32, %arg1: memref<2x8x256xf32, #tpu.memory_space<vmem>>, %arg2: memref<8x72xf32, #tpu.memory_space<vmem>>, %arg3: memref<9x1x256xf32, #tpu.memory_space<vmem>>, %arg4: memref<2x8x256xf32, #tpu.memory_space<vmem>>, %arg5: memref<72x512xf32, #tpu.memory_space<vmem>>) attributes {dimension_semantics = [#tpu.dimension_semantics<parallel>], iteration_bounds = array<i64: 1>, scalar_prefetch = 0 : i64, scratch_operands = 1 : i64, tpu.core_type = #tpu.core_type<tc>, window_params = [{transform_indices = @transform_0, window_bounds = array<i64: 2, 8, 256>}, {pipeline_mode = #tpu.pipeline_mode<synchronous>, transform_indices = @transform_1, window_bounds = array<i64: 8, 72>}, {pipeline_mode = #tpu.pipeline_mode<synchronous>, transform_indices = @transform_2, window_bounds = array<i64: 9, 1, 256>}, {transform_indices = @transform_3, window_bounds = array<i64: 2, 8, 256>}]} {
    %c0 = arith.constant 0 : index
    %c0_0 = arith.constant 0 : index
    %c0_1 = arith.constant 0 : index
    %0 = vector.load %arg1[%c0, %c0_0, %c0_1] : memref<2x8x256xf32, #tpu.memory_space<vmem>>, vector<2x8x256xf32>
    %c0_2 = arith.constant 0 : index
    %c0_3 = arith.constant 0 : index
    %c0_4 = arith.constant 0 : index
    %1 = vector.load %arg3[%c0_2, %c0_3, %c0_4] : memref<9x1x256xf32, #tpu.memory_space<vmem>>, vector<1x1x256xf32>
    %2 = vector.shape_cast %1 : vector<1x1x256xf32> to vector<1x256xf32>
    %3 = vector.extract_strided_slice %0 {offsets = [0, 0, 0], sizes = [1, 8, 256], strides = [1, 1, 1]} : vector<2x8x256xf32> to vector<1x8x256xf32>
    %4 = vector.shape_cast %3 : vector<1x8x256xf32> to vector<8x256xf32>
    %5 = vector.extract_strided_slice %4 {offsets = [0, 239], sizes = [8, 17], strides = [1, 1]} : vector<8x256xf32> to vector<8x17xf32>
    %6 = vector.extract_strided_slice %4 {offsets = [0, 0], sizes = [8, 239], strides = [1, 1]} : vector<8x256xf32> to vector<8x239xf32>
    %7 = tpu.concatenate %5, %6 in 1 : vector<8x17xf32>, vector<8x239xf32> -> vector<8x256xf32>
    %8 = vector.broadcast %2 : vector<1x256xf32> to vector<8x256xf32>
    %9 = arith.mulf %7, %8 : vector<8x256xf32>
    %c0_5 = arith.constant 0 : index
    %c0_6 = arith.constant 0 : index
    %10 = vector.load %arg5[%c0_5, %c0_6] : memref<72x512xf32, #tpu.memory_space<vmem>>, vector<8x256xf32>
    tpu.vector_store %arg5[%c0_5, %c0_6], %9 {strides = array<i32>} : memref<72x512xf32, #tpu.memory_space<vmem>>, vector<8x256xf32>,
    %11 = vector.extract_strided_slice %0 {offsets = [1, 0, 0], sizes = [1, 8, 256], strides = [1, 1, 1]} : vector<2x8x256xf32> to vector<1x8x256xf32>
    %12 = vector.shape_cast %11 : vector<1x8x256xf32> to vector<8x256xf32>
    %13 = vector.extract_strided_slice %12 {offsets = [0, 239], sizes = [8, 17], strides = [1, 1]} : vector<8x256xf32> to vector<8x17xf32>
    %14 = vector.extract_strided_slice %12 {offsets = [0, 0], sizes = [8, 239], strides = [1, 1]} : vector<8x256xf32> to vector<8x239xf32>
    %15 = tpu.concatenate %13, %14 in 1 : vector<8x17xf32>, vector<8x239xf32> -> vector<8x256xf32>
    %16 = vector.broadcast %2 : vector<1x256xf32> to vector<8x256xf32>
    %17 = arith.mulf %15, %16 : vector<8x256xf32>
    %c0_7 = arith.constant 0 : index
    %c256 = arith.constant 256 : index
    %18 = vector.load %arg5[%c0_7, %c256] : memref<72x512xf32, #tpu.memory_space<vmem>>, vector<8x256xf32>
    tpu.vector_store %arg5[%c0_7, %c256], %17 {strides = array<i32>} : memref<72x512xf32, #tpu.memory_space<vmem>>, vector<8x256xf32>,
    %c1 = arith.constant 1 : index
    %c0_8 = arith.constant 0 : index
    %c0_9 = arith.constant 0 : index
    %19 = vector.load %arg3[%c1, %c0_8, %c0_9] : memref<9x1x256xf32, #tpu.memory_space<vmem>>, vector<1x1x256xf32>
    %20 = vector.shape_cast %19 : vector<1x1x256xf32> to vector<1x256xf32>
    %21 = vector.extract_strided_slice %0 {offsets = [0, 0, 0], sizes = [1, 8, 256], strides = [1, 1, 1]} : vector<2x8x256xf32> to vector<1x8x256xf32>
    %22 = vector.shape_cast %21 : vector<1x8x256xf32> to vector<8x256xf32>
    %23 = vector.extract_strided_slice %22 {offsets = [0, 240], sizes = [8, 16], strides = [1, 1]} : vector<8x256xf32> to vector<8x16xf32>
    %24 = vector.extract_strided_slice %22 {offsets = [0, 0], sizes = [8, 240], strides = [1, 1]} : vector<8x256xf32> to vector<8x240xf32>
    %25 = tpu.concatenate %23, %24 in 1 : vector<8x16xf32>, vector<8x240xf32> -> vector<8x256xf32>
    %26 = vector.broadcast %20 : vector<1x256xf32> to vector<8x256xf32>
    %27 = arith.mulf %25, %26 : vector<8x256xf32>
    %c8 = arith.constant 8 : index
    %c0_10 = arith.constant 0 : index
    %28 = vector.load %arg5[%c8, %c0_10] : memref<72x512xf32, #tpu.memory_space<vmem>>, vector<8x256xf32>
    tpu.vector_store %arg5[%c8, %c0_10], %27 {strides = array<i32>} : memref<72x512xf32, #tpu.memory_space<vmem>>, vector<8x256xf32>,
    %29 = vector.extract_strided_slice %0 {offsets = [1, 0, 0], sizes = [1, 8, 256], strides = [1, 1, 1]} : vector<2x8x256xf32> to vector<1x8x256xf32>
    %30 = vector.shape_cast %29 : vector<1x8x256xf32> to vector<8x256xf32>
    %31 = vector.extract_strided_slice %30 {offsets = [0, 240], sizes = [8, 16], strides = [1, 1]} : vector<8x256xf32> to vector<8x16xf32>
    %32 = vector.extract_strided_slice %30 {offsets = [0, 0], sizes = [8, 240], strides = [1, 1]} : vector<8x256xf32> to vector<8x240xf32>
    %33 = tpu.concatenate %31, %32 in 1 : vector<8x16xf32>, vector<8x240xf32> -> vector<8x256xf32>
    %34 = vector.broadcast %20 : vector<1x256xf32> to vector<8x256xf32>
    %35 = arith.mulf %33, %34 : vector<8x256xf32>
    %c8_11 = arith.constant 8 : index
    %c256_12 = arith.constant 256 : index
    %36 = vector.load %arg5[%c8_11, %c256_12] : memref<72x512xf32, #tpu.memory_space<vmem>>, vector<8x256xf32>
    tpu.vector_store %arg5[%c8_11, %c256_12], %35 {strides = array<i32>} : memref<72x512xf32, #tpu.memory_space<vmem>>, vector<8x256xf32>,
    %c2 = arith.constant 2 : index
    %c0_13 = arith.constant 0 : index
    %c0_14 = arith.constant 0 : index
    %37 = vector.load %arg3[%c2, %c0_13, %c0_14] : memref<9x1x256xf32, #tpu.memory_space<vmem>>, vector<1x1x256xf32>
    %38 = vector.shape_cast %37 : vector<1x1x256xf32> to vector<1x256xf32>
    %39 = vector.extract_strided_slice %0 {offsets = [0, 0, 0], sizes = [1, 8, 256], strides = [1, 1, 1]} : vector<2x8x256xf32> to vector<1x8x256xf32>
    %40 = vector.shape_cast %39 : vector<1x8x256xf32> to vector<8x256xf32>
    %41 = vector.extract_strided_slice %40 {offsets = [0, 241], sizes = [8, 15], strides = [1, 1]} : vector<8x256xf32> to vector<8x15xf32>
    %42 = vector.extract_strided_slice %40 {offsets = [0, 0], sizes = [8, 241], strides = [1, 1]} : vector<8x256xf32> to vector<8x241xf32>
    %43 = tpu.concatenate %41, %42 in 1 : vector<8x15xf32>, vector<8x241xf32> -> vector<8x256xf32>
    %44 = vector.broadcast %38 : vector<1x256xf32> to vector<8x256xf32>
    %45 = arith.mulf %43, %44 : vector<8x256xf32>
    %c16 = arith.constant 16 : index
    %c0_15 = arith.constant 0 : index
    %46 = vector.load %arg5[%c16, %c0_15] : memref<72x512xf32, #tpu.memory_space<vmem>>, vector<8x256xf32>
    tpu.vector_store %arg5[%c16, %c0_15], %45 {strides = array<i32>} : memref<72x512xf32, #tpu.memory_space<vmem>>, vector<8x256xf32>,
    %47 = vector.extract_strided_slice %0 {offsets = [1, 0, 0], sizes = [1, 8, 256], strides = [1, 1, 1]} : vector<2x8x256xf32> to vector<1x8x256xf32>
    %48 = vector.shape_cast %47 : vector<1x8x256xf32> to vector<8x256xf32>
    %49 = vector.extract_strided_slice %48 {offsets = [0, 241], sizes = [8, 15], strides = [1, 1]} : vector<8x256xf32> to vector<8x15xf32>
    %50 = vector.extract_strided_slice %48 {offsets = [0, 0], sizes = [8, 241], strides = [1, 1]} : vector<8x256xf32> to vector<8x241xf32>
    %51 = tpu.concatenate %49, %50 in 1 : vector<8x15xf32>, vector<8x241xf32> -> vector<8x256xf32>
    %52 = vector.broadcast %38 : vector<1x256xf32> to vector<8x256xf32>
    %53 = arith.mulf %51, %52 : vector<8x256xf32>
    %c16_16 = arith.constant 16 : index
    %c256_17 = arith.constant 256 : index
    %54 = vector.load %arg5[%c16_16, %c256_17] : memref<72x512xf32, #tpu.memory_space<vmem>>, vector<8x256xf32>
    tpu.vector_store %arg5[%c16_16, %c256_17], %53 {strides = array<i32>} : memref<72x512xf32, #tpu.memory_space<vmem>>, vector<8x256xf32>,
    %c3 = arith.constant 3 : index
    %c0_18 = arith.constant 0 : index
    %c0_19 = arith.constant 0 : index
    %55 = vector.load %arg3[%c3, %c0_18, %c0_19] : memref<9x1x256xf32, #tpu.memory_space<vmem>>, vector<1x1x256xf32>
    %56 = vector.shape_cast %55 : vector<1x1x256xf32> to vector<1x256xf32>
    %57 = vector.extract_strided_slice %0 {offsets = [0, 0, 0], sizes = [1, 8, 256], strides = [1, 1, 1]} : vector<2x8x256xf32> to vector<1x8x256xf32>
    %58 = vector.shape_cast %57 : vector<1x8x256xf32> to vector<8x256xf32>
    %59 = vector.extract_strided_slice %58 {offsets = [0, 255], sizes = [8, 1], strides = [1, 1]} : vector<8x256xf32> to vector<8x1xf32>
    %60 = vector.extract_strided_slice %58 {offsets = [0, 0], sizes = [8, 255], strides = [1, 1]} : vector<8x256xf32> to vector<8x255xf32>
    %61 = tpu.concatenate %59, %60 in 1 : vector<8x1xf32>, vector<8x255xf32> -> vector<8x256xf32>
    %62 = vector.broadcast %56 : vector<1x256xf32> to vector<8x256xf32>
    %63 = arith.mulf %61, %62 : vector<8x256xf32>
    %c24 = arith.constant 24 : index
    %c0_20 = arith.constant 0 : index
    %64 = vector.load %arg5[%c24, %c0_20] : memref<72x512xf32, #tpu.memory_space<vmem>>, vector<8x256xf32>
    tpu.vector_store %arg5[%c24, %c0_20], %63 {strides = array<i32>} : memref<72x512xf32, #tpu.memory_space<vmem>>, vector<8x256xf32>,
    %65 = vector.extract_strided_slice %0 {offsets = [1, 0, 0], sizes = [1, 8, 256], strides = [1, 1, 1]} : vector<2x8x256xf32> to vector<1x8x256xf32>
    %66 = vector.shape_cast %65 : vector<1x8x256xf32> to vector<8x256xf32>
    %67 = vector.extract_strided_slice %66 {offsets = [0, 255], sizes = [8, 1], strides = [1, 1]} : vector<8x256xf32> to vector<8x1xf32>
    %68 = vector.extract_strided_slice %66 {offsets = [0, 0], sizes = [8, 255], strides = [1, 1]} : vector<8x256xf32> to vector<8x255xf32>
    %69 = tpu.concatenate %67, %68 in 1 : vector<8x1xf32>, vector<8x255xf32> -> vector<8x256xf32>
    %70 = vector.broadcast %56 : vector<1x256xf32> to vector<8x256xf32>
    %71 = arith.mulf %69, %70 : vector<8x256xf32>
    %c24_21 = arith.constant 24 : index
    %c256_22 = arith.constant 256 : index
    %72 = vector.load %arg5[%c24_21, %c256_22] : memref<72x512xf32, #tpu.memory_space<vmem>>, vector<8x256xf32>
    tpu.vector_store %arg5[%c24_21, %c256_22], %71 {strides = array<i32>} : memref<72x512xf32, #tpu.memory_space<vmem>>, vector<8x256xf32>,
    %c4 = arith.constant 4 : index
    %c0_23 = arith.constant 0 : index
    %c0_24 = arith.constant 0 : index
    %73 = vector.load %arg3[%c4, %c0_23, %c0_24] : memref<9x1x256xf32, #tpu.memory_space<vmem>>, vector<1x1x256xf32>
    %74 = vector.shape_cast %73 : vector<1x1x256xf32> to vector<1x256xf32>
    %75 = vector.extract_strided_slice %0 {offsets = [0, 0, 0], sizes = [1, 8, 256], strides = [1, 1, 1]} : vector<2x8x256xf32> to vector<1x8x256xf32>
    %76 = vector.shape_cast %75 : vector<1x8x256xf32> to vector<8x256xf32>
    %77 = vector.broadcast %74 : vector<1x256xf32> to vector<8x256xf32>
    %78 = arith.mulf %76, %77 : vector<8x256xf32>
    %c32 = arith.constant 32 : index
    %c0_25 = arith.constant 0 : index
    %79 = vector.load %arg5[%c32, %c0_25] : memref<72x512xf32, #tpu.memory_space<vmem>>, vector<8x256xf32>
    tpu.vector_store %arg5[%c32, %c0_25], %78 {strides = array<i32>} : memref<72x512xf32, #tpu.memory_space<vmem>>, vector<8x256xf32>,
    %80 = vector.extract_strided_slice %0 {offsets = [1, 0, 0], sizes = [1, 8, 256], strides = [1, 1, 1]} : vector<2x8x256xf32> to vector<1x8x256xf32>
    %81 = vector.shape_cast %80 : vector<1x8x256xf32> to vector<8x256xf32>
    %82 = vector.broadcast %74 : vector<1x256xf32> to vector<8x256xf32>
    %83 = arith.mulf %81, %82 : vector<8x256xf32>
    %c32_26 = arith.constant 32 : index
    %c256_27 = arith.constant 256 : index
    %84 = vector.load %arg5[%c32_26, %c256_27] : memref<72x512xf32, #tpu.memory_space<vmem>>, vector<8x256xf32>
    tpu.vector_store %arg5[%c32_26, %c256_27], %83 {strides = array<i32>} : memref<72x512xf32, #tpu.memory_space<vmem>>, vector<8x256xf32>,
    %c5 = arith.constant 5 : index
    %c0_28 = arith.constant 0 : index
    %c0_29 = arith.constant 0 : index
    %85 = vector.load %arg3[%c5, %c0_28, %c0_29] : memref<9x1x256xf32, #tpu.memory_space<vmem>>, vector<1x1x256xf32>
    %86 = vector.shape_cast %85 : vector<1x1x256xf32> to vector<1x256xf32>
    %87 = vector.extract_strided_slice %0 {offsets = [0, 0, 0], sizes = [1, 8, 256], strides = [1, 1, 1]} : vector<2x8x256xf32> to vector<1x8x256xf32>
    %88 = vector.shape_cast %87 : vector<1x8x256xf32> to vector<8x256xf32>
    %89 = vector.extract_strided_slice %88 {offsets = [0, 1], sizes = [8, 255], strides = [1, 1]} : vector<8x256xf32> to vector<8x255xf32>
    %90 = vector.extract_strided_slice %88 {offsets = [0, 0], sizes = [8, 1], strides = [1, 1]} : vector<8x256xf32> to vector<8x1xf32>
    %91 = tpu.concatenate %89, %90 in 1 : vector<8x255xf32>, vector<8x1xf32> -> vector<8x256xf32>
    %92 = vector.broadcast %86 : vector<1x256xf32> to vector<8x256xf32>
    %93 = arith.mulf %91, %92 : vector<8x256xf32>
    %c40 = arith.constant 40 : index
    %c0_30 = arith.constant 0 : index
    %94 = vector.load %arg5[%c40, %c0_30] : memref<72x512xf32, #tpu.memory_space<vmem>>, vector<8x256xf32>
    tpu.vector_store %arg5[%c40, %c0_30], %93 {strides = array<i32>} : memref<72x512xf32, #tpu.memory_space<vmem>>, vector<8x256xf32>,
    %95 = vector.extract_strided_slice %0 {offsets = [1, 0, 0], sizes = [1, 8, 256], strides = [1, 1, 1]} : vector<2x8x256xf32> to vector<1x8x256xf32>
    %96 = vector.shape_cast %95 : vector<1x8x256xf32> to vector<8x256xf32>
    %97 = vector.extract_strided_slice %96 {offsets = [0, 1], sizes = [8, 255], strides = [1, 1]} : vector<8x256xf32> to vector<8x255xf32>
    %98 = vector.extract_strided_slice %96 {offsets = [0, 0], sizes = [8, 1], strides = [1, 1]} : vector<8x256xf32> to vector<8x1xf32>
    %99 = tpu.concatenate %97, %98 in 1 : vector<8x255xf32>, vector<8x1xf32> -> vector<8x256xf32>
    %100 = vector.broadcast %86 : vector<1x256xf32> to vector<8x256xf32>
    %101 = arith.mulf %99, %100 : vector<8x256xf32>
    %c40_31 = arith.constant 40 : index
    %c256_32 = arith.constant 256 : index
    %102 = vector.load %arg5[%c40_31, %c256_32] : memref<72x512xf32, #tpu.memory_space<vmem>>, vector<8x256xf32>
    tpu.vector_store %arg5[%c40_31, %c256_32], %101 {strides = array<i32>} : memref<72x512xf32, #tpu.memory_space<vmem>>, vector<8x256xf32>,
    %c6 = arith.constant 6 : index
    %c0_33 = arith.constant 0 : index
    %c0_34 = arith.constant 0 : index
    %103 = vector.load %arg3[%c6, %c0_33, %c0_34] : memref<9x1x256xf32, #tpu.memory_space<vmem>>, vector<1x1x256xf32>
    %104 = vector.shape_cast %103 : vector<1x1x256xf32> to vector<1x256xf32>
    %105 = vector.extract_strided_slice %0 {offsets = [0, 0, 0], sizes = [1, 8, 256], strides = [1, 1, 1]} : vector<2x8x256xf32> to vector<1x8x256xf32>
    %106 = vector.shape_cast %105 : vector<1x8x256xf32> to vector<8x256xf32>
    %107 = vector.extract_strided_slice %106 {offsets = [0, 15], sizes = [8, 241], strides = [1, 1]} : vector<8x256xf32> to vector<8x241xf32>
    %108 = vector.extract_strided_slice %106 {offsets = [0, 0], sizes = [8, 15], strides = [1, 1]} : vector<8x256xf32> to vector<8x15xf32>
    %109 = tpu.concatenate %107, %108 in 1 : vector<8x241xf32>, vector<8x15xf32> -> vector<8x256xf32>
    %110 = vector.broadcast %104 : vector<1x256xf32> to vector<8x256xf32>
    %111 = arith.mulf %109, %110 : vector<8x256xf32>
    %c48 = arith.constant 48 : index
    %c0_35 = arith.constant 0 : index
    %112 = vector.load %arg5[%c48, %c0_35] : memref<72x512xf32, #tpu.memory_space<vmem>>, vector<8x256xf32>
    tpu.vector_store %arg5[%c48, %c0_35], %111 {strides = array<i32>} : memref<72x512xf32, #tpu.memory_space<vmem>>, vector<8x256xf32>,
    %113 = vector.extract_strided_slice %0 {offsets = [1, 0, 0], sizes = [1, 8, 256], strides = [1, 1, 1]} : vector<2x8x256xf32> to vector<1x8x256xf32>
    %114 = vector.shape_cast %113 : vector<1x8x256xf32> to vector<8x256xf32>
    %115 = vector.extract_strided_slice %114 {offsets = [0, 15], sizes = [8, 241], strides = [1, 1]} : vector<8x256xf32> to vector<8x241xf32>
    %116 = vector.extract_strided_slice %114 {offsets = [0, 0], sizes = [8, 15], strides = [1, 1]} : vector<8x256xf32> to vector<8x15xf32>
    %117 = tpu.concatenate %115, %116 in 1 : vector<8x241xf32>, vector<8x15xf32> -> vector<8x256xf32>
    %118 = vector.broadcast %104 : vector<1x256xf32> to vector<8x256xf32>
    %119 = arith.mulf %117, %118 : vector<8x256xf32>
    %c48_36 = arith.constant 48 : index
    %c256_37 = arith.constant 256 : index
    %120 = vector.load %arg5[%c48_36, %c256_37] : memref<72x512xf32, #tpu.memory_space<vmem>>, vector<8x256xf32>
    tpu.vector_store %arg5[%c48_36, %c256_37], %119 {strides = array<i32>} : memref<72x512xf32, #tpu.memory_space<vmem>>, vector<8x256xf32>,
    %c7 = arith.constant 7 : index
    %c0_38 = arith.constant 0 : index
    %c0_39 = arith.constant 0 : index
    %121 = vector.load %arg3[%c7, %c0_38, %c0_39] : memref<9x1x256xf32, #tpu.memory_space<vmem>>, vector<1x1x256xf32>
    %122 = vector.shape_cast %121 : vector<1x1x256xf32> to vector<1x256xf32>
    %123 = vector.extract_strided_slice %0 {offsets = [0, 0, 0], sizes = [1, 8, 256], strides = [1, 1, 1]} : vector<2x8x256xf32> to vector<1x8x256xf32>
    %124 = vector.shape_cast %123 : vector<1x8x256xf32> to vector<8x256xf32>
    %125 = vector.extract_strided_slice %124 {offsets = [0, 16], sizes = [8, 240], strides = [1, 1]} : vector<8x256xf32> to vector<8x240xf32>
    %126 = vector.extract_strided_slice %124 {offsets = [0, 0], sizes = [8, 16], strides = [1, 1]} : vector<8x256xf32> to vector<8x16xf32>
    %127 = tpu.concatenate %125, %126 in 1 : vector<8x240xf32>, vector<8x16xf32> -> vector<8x256xf32>
    %128 = vector.broadcast %122 : vector<1x256xf32> to vector<8x256xf32>
    %129 = arith.mulf %127, %128 : vector<8x256xf32>
    %c56 = arith.constant 56 : index
    %c0_40 = arith.constant 0 : index
    %130 = vector.load %arg5[%c56, %c0_40] : memref<72x512xf32, #tpu.memory_space<vmem>>, vector<8x256xf32>
    tpu.vector_store %arg5[%c56, %c0_40], %129 {strides = array<i32>} : memref<72x512xf32, #tpu.memory_space<vmem>>, vector<8x256xf32>,
    %131 = vector.extract_strided_slice %0 {offsets = [1, 0, 0], sizes = [1, 8, 256], strides = [1, 1, 1]} : vector<2x8x256xf32> to vector<1x8x256xf32>
    %132 = vector.shape_cast %131 : vector<1x8x256xf32> to vector<8x256xf32>
    %133 = vector.extract_strided_slice %132 {offsets = [0, 16], sizes = [8, 240], strides = [1, 1]} : vector<8x256xf32> to vector<8x240xf32>
    %134 = vector.extract_strided_slice %132 {offsets = [0, 0], sizes = [8, 16], strides = [1, 1]} : vector<8x256xf32> to vector<8x16xf32>
    %135 = tpu.concatenate %133, %134 in 1 : vector<8x240xf32>, vector<8x16xf32> -> vector<8x256xf32>
    %136 = vector.broadcast %122 : vector<1x256xf32> to vector<8x256xf32>
    %137 = arith.mulf %135, %136 : vector<8x256xf32>
    %c56_41 = arith.constant 56 : index
    %c256_42 = arith.constant 256 : index
    %138 = vector.load %arg5[%c56_41, %c256_42] : memref<72x512xf32, #tpu.memory_space<vmem>>, vector<8x256xf32>
    tpu.vector_store %arg5[%c56_41, %c256_42], %137 {strides = array<i32>} : memref<72x512xf32, #tpu.memory_space<vmem>>, vector<8x256xf32>,
    %c8_43 = arith.constant 8 : index
    %c0_44 = arith.constant 0 : index
    %c0_45 = arith.constant 0 : index
    %139 = vector.load %arg3[%c8_43, %c0_44, %c0_45] : memref<9x1x256xf32, #tpu.memory_space<vmem>>, vector<1x1x256xf32>
    %140 = vector.shape_cast %139 : vector<1x1x256xf32> to vector<1x256xf32>
    %141 = vector.extract_strided_slice %0 {offsets = [0, 0, 0], sizes = [1, 8, 256], strides = [1, 1, 1]} : vector<2x8x256xf32> to vector<1x8x256xf32>
    %142 = vector.shape_cast %141 : vector<1x8x256xf32> to vector<8x256xf32>
    %143 = vector.extract_strided_slice %142 {offsets = [0, 17], sizes = [8, 239], strides = [1, 1]} : vector<8x256xf32> to vector<8x239xf32>
    %144 = vector.extract_strided_slice %142 {offsets = [0, 0], sizes = [8, 17], strides = [1, 1]} : vector<8x256xf32> to vector<8x17xf32>
    %145 = tpu.concatenate %143, %144 in 1 : vector<8x239xf32>, vector<8x17xf32> -> vector<8x256xf32>
    %146 = vector.broadcast %140 : vector<1x256xf32> to vector<8x256xf32>
    %147 = arith.mulf %145, %146 : vector<8x256xf32>
    %c64 = arith.constant 64 : index
    %c0_46 = arith.constant 0 : index
    %148 = vector.load %arg5[%c64, %c0_46] : memref<72x512xf32, #tpu.memory_space<vmem>>, vector<8x256xf32>
    tpu.vector_store %arg5[%c64, %c0_46], %147 {strides = array<i32>} : memref<72x512xf32, #tpu.memory_space<vmem>>, vector<8x256xf32>,
    %149 = vector.extract_strided_slice %0 {offsets = [1, 0, 0], sizes = [1, 8, 256], strides = [1, 1, 1]} : vector<2x8x256xf32> to vector<1x8x256xf32>
    %150 = vector.shape_cast %149 : vector<1x8x256xf32> to vector<8x256xf32>
    %151 = vector.extract_strided_slice %150 {offsets = [0, 17], sizes = [8, 239], strides = [1, 1]} : vector<8x256xf32> to vector<8x239xf32>
    %152 = vector.extract_strided_slice %150 {offsets = [0, 0], sizes = [8, 17], strides = [1, 1]} : vector<8x256xf32> to vector<8x17xf32>
    %153 = tpu.concatenate %151, %152 in 1 : vector<8x239xf32>, vector<8x17xf32> -> vector<8x256xf32>
    %154 = vector.broadcast %140 : vector<1x256xf32> to vector<8x256xf32>
    %155 = arith.mulf %153, %154 : vector<8x256xf32>
    %c64_47 = arith.constant 64 : index
    %c256_48 = arith.constant 256 : index
    %156 = vector.load %arg5[%c64_47, %c256_48] : memref<72x512xf32, #tpu.memory_space<vmem>>, vector<8x256xf32>
    tpu.vector_store %arg5[%c64_47, %c256_48], %155 {strides = array<i32>} : memref<72x512xf32, #tpu.memory_space<vmem>>, vector<8x256xf32>,
    %c0_49 = arith.constant 0 : index
    %c0_50 = arith.constant 0 : index
    %157 = vector.load %arg2[%c0_49, %c0_50] : memref<8x72xf32, #tpu.memory_space<vmem>>, vector<8x72xf32>
    %c0_51 = arith.constant 0 : index
    %c0_52 = arith.constant 0 : index
    %158 = vector.load %arg5[%c0_51, %c0_52] : memref<72x512xf32, #tpu.memory_space<vmem>>, vector<72x512xf32>
    %cst = arith.constant dense<0.000000e+00> : vector<8x512xf32>
    %159 = tpu.matmul %157, %158, %cst {dimension_numbers = #tpu.dot_dimension_numbers<[1], [0], [0], [1], [0, 0, 1, 1], [], []>} : vector<8x72xf32>, vector<72x512xf32>, vector<8x512xf32> -> vector<8x512xf32>
    %160 = vector.extract_strided_slice %159 {offsets = [0, 0], sizes = [8, 256], strides = [1, 1]} : vector<8x512xf32> to vector<8x256xf32>
    %cst_53 = arith.constant dense<0.000000e+00> : vector<8xf32>
    %161 = vector.multi_reduction <add>, %160, %cst_53 [1] : vector<8x256xf32> to vector<8xf32>
    %162 = vector.shape_cast %161 : vector<8xf32> to vector<8x1xf32>
    %cst_54 = arith.constant 3.906250e-03 : f32
    %163 = vector.broadcast %cst_54 : f32 to vector<8x1xf32>
    %164 = arith.mulf %162, %163 : vector<8x1xf32>
    %165 = vector.broadcast %164 : vector<8x1xf32> to vector<8x256xf32>
    %166 = arith.subf %160, %165 : vector<8x256xf32>
    %167 = arith.mulf %166, %166 : vector<8x256xf32>
    %cst_55 = arith.constant dense<0.000000e+00> : vector<8xf32>
    %168 = vector.multi_reduction <add>, %167, %cst_55 [1] : vector<8x256xf32> to vector<8xf32>
    %169 = vector.shape_cast %168 : vector<8xf32> to vector<8x1xf32>
    %cst_56 = arith.constant 3.906250e-03 : f32
    %170 = vector.broadcast %cst_56 : f32 to vector<8x1xf32>
    %171 = arith.mulf %169, %170 : vector<8x1xf32>
    %cst_57 = arith.constant 9.99999974E-6 : f32
    %172 = vector.broadcast %cst_57 : f32 to vector<8x1xf32>
    %173 = arith.addf %171, %172 : vector<8x1xf32>
    %174 = math.rsqrt %173 : vector<8x1xf32>
    %175 = vector.broadcast %174 : vector<8x1xf32> to vector<8x256xf32>
    %176 = arith.mulf %166, %175 : vector<8x256xf32>
    %177 = vector.extract_strided_slice %0 {offsets = [0, 0, 0], sizes = [1, 8, 256], strides = [1, 1, 1]} : vector<2x8x256xf32> to vector<1x8x256xf32>
    %178 = vector.shape_cast %177 : vector<1x8x256xf32> to vector<8x256xf32>
    %cst_58 = arith.constant 0.000000e+00 : f32
    %179 = vector.broadcast %cst_58 : f32 to vector<8x256xf32>
    %180 = arith.maximumf %176, %179 : vector<8x256xf32>
    %181 = arith.addf %178, %180 : vector<8x256xf32>
    %c0_59 = arith.constant 0 : index
    %c0_60 = arith.constant 0 : index
    %c0_61 = arith.constant 0 : index
    %182 = vector.load %arg4[%c0_59, %c0_60, %c0_61] : memref<2x8x256xf32, #tpu.memory_space<vmem>>, vector<1x8x256xf32>
    %183 = vector.shape_cast %182 : vector<1x8x256xf32> to vector<8x256xf32>
    %184 = vector.shape_cast %181 : vector<8x256xf32> to vector<1x8x256xf32>
    tpu.vector_store %arg4[%c0_59, %c0_60, %c0_61], %184 {strides = array<i32>} : memref<2x8x256xf32, #tpu.memory_space<vmem>>, vector<1x8x256xf32>,
    %185 = vector.extract_strided_slice %159 {offsets = [0, 256], sizes = [8, 256], strides = [1, 1]} : vector<8x512xf32> to vector<8x256xf32>
    %cst_62 = arith.constant dense<0.000000e+00> : vector<8xf32>
    %186 = vector.multi_reduction <add>, %185, %cst_62 [1] : vector<8x256xf32> to vector<8xf32>
    %187 = vector.shape_cast %186 : vector<8xf32> to vector<8x1xf32>
    %cst_63 = arith.constant 3.906250e-03 : f32
    %188 = vector.broadcast %cst_63 : f32 to vector<8x1xf32>
    %189 = arith.mulf %187, %188 : vector<8x1xf32>
    %190 = vector.broadcast %189 : vector<8x1xf32> to vector<8x256xf32>
    %191 = arith.subf %185, %190 : vector<8x256xf32>
    %192 = arith.mulf %191, %191 : vector<8x256xf32>
    %cst_64 = arith.constant dense<0.000000e+00> : vector<8xf32>
    %193 = vector.multi_reduction <add>, %192, %cst_64 [1] : vector<8x256xf32> to vector<8xf32>
    %194 = vector.shape_cast %193 : vector<8xf32> to vector<8x1xf32>
    %cst_65 = arith.constant 3.906250e-03 : f32
    %195 = vector.broadcast %cst_65 : f32 to vector<8x1xf32>
    %196 = arith.mulf %194, %195 : vector<8x1xf32>
    %cst_66 = arith.constant 9.99999974E-6 : f32
    %197 = vector.broadcast %cst_66 : f32 to vector<8x1xf32>
    %198 = arith.addf %196, %197 : vector<8x1xf32>
    %199 = math.rsqrt %198 : vector<8x1xf32>
    %200 = vector.broadcast %199 : vector<8x1xf32> to vector<8x256xf32>
    %201 = arith.mulf %191, %200 : vector<8x256xf32>
    %202 = vector.extract_strided_slice %0 {offsets = [1, 0, 0], sizes = [1, 8, 256], strides = [1, 1, 1]} : vector<2x8x256xf32> to vector<1x8x256xf32>
    %203 = vector.shape_cast %202 : vector<1x8x256xf32> to vector<8x256xf32>
    %cst_67 = arith.constant 0.000000e+00 : f32
    %204 = vector.broadcast %cst_67 : f32 to vector<8x256xf32>
    %205 = arith.maximumf %201, %204 : vector<8x256xf32>
    %206 = arith.addf %203, %205 : vector<8x256xf32>
    %c1_68 = arith.constant 1 : index
    %c0_69 = arith.constant 0 : index
    %c0_70 = arith.constant 0 : index
    %207 = vector.load %arg4[%c1_68, %c0_69, %c0_70] : memref<2x8x256xf32, #tpu.memory_space<vmem>>, vector<1x8x256xf32>
    %208 = vector.shape_cast %207 : vector<1x8x256xf32> to vector<8x256xf32>
    %209 = vector.shape_cast %206 : vector<8x256xf32> to vector<1x8x256xf32>
    tpu.vector_store %arg4[%c1_68, %c0_69, %c0_70], %209 {strides = array<i32>} : memref<2x8x256xf32, #tpu.memory_space<vmem>>, vector<1x8x256xf32>,
    return
  }
  func.func @transform_0(%arg0: i32) -> (i32, i32, i32) {
    %c0_i32 = arith.constant 0 : i32
    %c0_i32_0 = arith.constant 0 : i32
    %c0_i32_1 = arith.constant 0 : i32
    return %arg0, %c0_i32, %c0_i32_0 : i32, i32, i32
  }
  func.func @transform_1(%arg0: i32) -> (i32, i32) {
    %c0_i32 = arith.constant 0 : i32
    %c0_i32_0 = arith.constant 0 : i32
    %c0_i32_1 = arith.constant 0 : i32
    return %c0_i32, %c0_i32_0 : i32, i32
  }
  func.func @transform_2(%arg0: i32) -> (i32, i32, i32) {
    %c0_i32 = arith.constant 0 : i32
    %c0_i32_0 = arith.constant 0 : i32
    %c0_i32_1 = arith.constant 0 : i32
    %c0_i32_2 = arith.constant 0 : i32
    return %c0_i32, %c0_i32_0, %c0_i32_1 : i32, i32, i32
  }
  func.func @transform_3(%arg0: i32) -> (i32, i32, i32) {
    %c0_i32 = arith.constant 0 : i32
    %c0_i32_0 = arith.constant 0 : i32
    %c0_i32_1 = arith.constant 0 : i32
    return %arg0, %c0_i32, %c0_i32_0 : i32, i32, i32
  }
}

</mosaic_0001>

<bundles_post_ra>
// kernel: tpu_custom_call.1
= control target key start
LH: loop header
LB: loop body
LE: loop exit
PB: predicated region body
PF: predicated region fallthrough
CT: control target
= control target key end

     0   :  { %6 = vsyncpa [#allocation3], 0  ;;  %s106_s0 = inlined_call_operand.hbm [shape: f32[8,128], index: 0, kind: input, shape index: {}]   ;;  %s107_s1 = inlined_call_operand.hbm [shape: f32[8,128], index: 1, kind: output, shape index: {}]  }
   0x1   :  { %7 = vsyncpa [#allocation4], 0  ;;  %s87_s6 = smov [#allocation2]  }
   0x2   :  { %s14_s7 = sshll.u32 %s87_s6, 4  ;;  %s15_s7 = int_to_ptr.vmem [resolvable:$true] %s14_s7 }
   0x3   :  { %s51_s8 = scalar_lea.vmem %s15_s7, 128  ;;  %p56_p1 = scmp.lt.s32.totalorder %s15_s7, %s15_s7 }
   0x4   :  { %p52_p0 = scmp.ne.s32.totalorder %s15_s7, %s51_s8  ;;  %p57_p2 = scmp.lt.s32.totalorder %s51_s8, %s51_s8 }
   0x6   :  { %p58_p3 = por %p57_p2, %p56_p1 }
   0x8   :  { %p59_p4 = pnand %p58_p3, %p52_p0 }
   0xa   :  { %62 = shalt.err (!%p59_p4)
}
   0xb   :  { %17 = dma.hbm_to_vmem [thread:$0]  %s106_s0, 128, %s15_s7, [#allocation3]  }
   0xc   :  { %83 = dma.done.wait [#allocation3], 128  }
   0xd   :  { %84 = vsyncadd [#allocation3], 4294967168  ;;  %v21_v0 = vld [vmem:[#allocation2] sm:$0xff]  ;;  %s88_s11 = smov 1   ;;  %s89_s12 = smov [#allocation5]  }
   0xe   :  { %22 = vrot.lane.b32.xlu0 %v21_v0, %s88_s11  ;;  %s31_s13 = sshll.u32 %s89_s12, 4  ;;  %s32_s13 = int_to_ptr.vmem [resolvable:$true] %s31_s13 }
   0xf   :  { %s63_s14 = scalar_lea.vmem %s32_s13, 128  ;;  %p68_p6 = scmp.lt.s32.totalorder %s32_s13, %s32_s13 }
  0x10   :  { %p64_p5 = scmp.ne.s32.totalorder %s32_s13, %s63_s14  ;;  %p69_p7 = scmp.lt.s32.totalorder %s63_s14, %s63_s14 }
  0x12   :  { %p70_p8 = por %p69_p7, %p68_p6 }
  0x14   :  { %p71_p9 = pnand %p70_p8, %p64_p5 }
  0x80   :  { %v23_v1 = vpop.permute.xlu0 %22 }
  0x81   :  { %24 = vst [vmem:[#allocation5] sm:$0xff] %v23_v1 }
  0x82   :  { %74 = shalt.err (!%p71_p9)
}
  0x83   :  { %34 = dma.vmem_to_hbm [thread:$0]  %s32_s13, 128, %s107_s1, [#allocation4]  }
  0x84   :  { %85 = dma.done.wait [#allocation4], 128  }
  0x85   :  { %86 = vsyncadd [#allocation4], 4294967168 }
  0x86   :  { %38 = vsyncpa [#allocation3], 1 }
  0x87   :  { %39 = vsyncpa [#allocation4], 1 }

// kernel: tpu_custom_call.1
= control target key start
LH: loop header
LB: loop body
LE: loop exit
PB: predicated region body
PF: predicated region fallthrough
CT: control target
= control target key end

     0   :  { %8 = vsyncpa [#allocation4], 0  ;;  %s912_s0 = inlined_call_operand.hbm [shape: f32[2,8,256], index: 0, kind: input, shape index: {}]   ;;  %s913_s1 = inlined_call_operand.hbm [shape: f32[8,72], index: 1, kind: input, shape index: {}]   ;;  %s914_s2 = inlined_call_operand.hbm [shape: f32[9,1,256], index: 2, kind: input, shape index: {}]   ;;  %s915_s3 = inlined_call_operand.hbm [shape: f32[2,8,256], index: 3, kind: output, shape index: {}]  }
   0x1   :  { %9 = vsyncpa [#allocation7], 0 }
   0x2   :  { %10 = vsyncpa [#allocation5], 0  ;;  %s756_s12 = smov [#allocation6]   ;;  %s757_s14 = smov [#allocation3]  }
   0x3   :  { %s29_s13 = sshll.u32 %s756_s12, 4  ;;  %s16_s15 = sshll.u32 %s757_s14, 4  ;;  %s30_s13 = int_to_ptr.vmem [resolvable:$true] %s29_s13  ;;  %s17_s15 = int_to_ptr.vmem [resolvable:$true] %s16_s15 }
   0x4   :  { %s678_s16 = scalar_lea.vmem %s30_s13, 128  ;;  %p683_p1 = scmp.lt.s32.totalorder %s30_s13, %s30_s13 }
   0x5   :  { %p679_p0 = scmp.ne.s32.totalorder %s30_s13, %s678_s16  ;;  %p684_p2 = scmp.lt.s32.totalorder %s678_s16, %s678_s16 }
   0x7   :  { %p685_p3 = por %p684_p2, %p683_p1 }
   0x9   :  { %p686_p4 = pnand %p685_p3, %p679_p0 }
   0xb   :  { %689 = shalt.err (!%p686_p4)
}
   0xc   :  { %32 = dma.hbm_to_vmem [thread:$0]  %s913_s1, 128, %s30_s13, [#allocation7]  }
   0xd   :  { %s698_s19 = scalar_lea.vmem %s17_s15, 512  ;;  %p703_p6 = scmp.lt.s32.totalorder %s17_s15, %s17_s15 }
   0xe   :  { %p699_p5 = scmp.ne.s32.totalorder %s17_s15, %s698_s19  ;;  %p704_p7 = scmp.lt.s32.totalorder %s698_s19, %s698_s19 }
  0x10   :  { %p705_p8 = por %p704_p7, %p703_p6 }
  0x12   :  { %p706_p9 = pnand %p705_p8, %p699_p5 }
  0x14   :  { %709 = shalt.err (!%p706_p9)
}
  0x15   :  { %s758_s20 = smov 256   ;;  %s759_s21 = smov 16  }
  0x16   :  { %22 = dma.hbm_to_vmem [thread:$0]  %s912_s0, 512, %s17_s15, [#allocation4], %s758_s20, %s758_s20, %s759_s21  }
  0x17   :  { %s760_s24 = smov [#allocation8]  }
  0x18   :  { %s38_s25 = sshll.u32 %s760_s24, 4  ;;  %s39_s25 = int_to_ptr.vmem [resolvable:$true] %s38_s25 }
  0x19   :  { %s718_s1 = scalar_lea.vmem %s39_s25, 288  ;;  %p723_p11 = scmp.lt.s32.totalorder %s39_s25, %s39_s25 }
  0x1a   :  { %p719_p10 = scmp.ne.s32.totalorder %s39_s25, %s718_s1  ;;  %p724_p12 = scmp.lt.s32.totalorder %s718_s1, %s718_s1 }
  0x1c   :  { %p725_p13 = por %p724_p12, %p723_p11 }
  0x1e   :  { %p726_p0 = pnand %p725_p13, %p719_p10 }
  0x20   :  { %729 = shalt.err (!%p726_p0)
}
  0x21   :  { %s761_s26 = smov 32   ;;  %s762_s27 = smov 2  }
  0x22   :  { %44 = dma.hbm_to_vmem [thread:$0]  %s914_s2, 288, %s39_s25, [#allocation7], %s761_s26, %s761_s26, %s762_s27  }
  0x23   :  { %750 = dma.done.wait [#allocation4], 512  }
  0x24   :  { %751 = vsyncadd [#allocation4], 4294966784 }
  0x25   :  { %752 = dma.done.wait [#allocation7], 416  }
  0x26   :  { %753 = vsyncadd [#allocation7], 4294966880  ;;  %v804_v0 = vld [vmem:[#allocation3 + $0x10] sm:$0xff]  ;;  %v806_v1 = vld [vmem:[#allocation3] sm:$0xff]  ;;  %s763_s0 = smov 111   ;;  %s764_s2 = smov 112   ;;  %v72_v5 = vlaneseq }
  0x27   :  { %389 = vrot.lane.b32.xlu1 %v804_v0, %s763_s0  ;;  %364 = vrot.lane.b32.xlu0 %v806_v1, %s763_s0  ;;  %v810_v2 = vld [vmem:[#allocation3 + $0x18] sm:$0xff]  ;;  %v812_v3 = vld [vmem:[#allocation3 + $0x8] sm:$0xff]  ;;  %s765_s30 = smov 113   ;;  %s766_s4 = smov 127   ;;  %v769_v4 = vmov 0.0   ;;  %vm368_vm0 = vcmask 908288  }
  0x28   :  { %s767_s5 = smov 1   ;;  %s768_s6 = smov 15   ;;  %507 = vmatprep.mubr.f32.mxu0 %v769_v4  ;;  %578 = vmatprep.mubr.f32.mxu1 %v769_v4  ;;  %v73_v6 = vshrl.u32 %v72_v5, 7  ;;  %v363_v9 = vld [vmem:[#allocation8 + $0x10] sm:$0x3]  ;;  %vm328_vm1 = vcmask 916480  }
  0x29   :  { %s770_s7 = smov 17   ;;  %v323_v12 = vld [vmem:[#allocation8 + $0xe] sm:$0x3]  ;;  %v283_v33 = vld [vmem:[#allocation8 + $0xc] sm:$0x3]  ;;  %vm288_vm2 = vcmask 924672  }
  0x2a   :  { %v848_v7 = vsub.s32 1, %v73_v6  ;;  %v850_v8 = vsub.s32 0, %v73_v6  ;;  %v243_v48 = vld [vmem:[#allocation8 + $0xa] sm:$0x3]  ;;  %v222_v49 = vld [vmem:[#allocation8 + $0x8] sm:$0x3] }
  0x2b   :  { %391 = vrot.lane.b32.xlu1 %v810_v2, %s763_s0  ;;  %366 = vrot.lane.b32.xlu0 %v812_v3, %s763_s0  ;;  %vm248_vm3 = vcmask 1039360   ;;  %v182_v6 = vld [vmem:[#allocation8 + $0x6] sm:$0x3]  ;;  %vm188_vm4 = vcmask 7168   ;;  %vm148_vm5 = vcmask 121856   ;;  %vm108_vm6 = vcmask 130048  }
  0x2c   :  { %v382_v13 = vrot.slane %v363_v9, %v848_v7  ;;  %v378_v14 = vrot.slane %v363_v9, %v850_v8  ;;  %v338_v17 = vrot.slane %v323_v12, %v850_v8  ;;  %v342_v18 = vrot.slane %v323_v12, %v848_v7  ;;  %s771_s8 = smov [#allocation9]  }
  0x2d   :  { %v298_v40 = vrot.slane %v283_v33, %v850_v8  ;;  %v302_v41 = vrot.slane %v283_v33, %v848_v7  ;;  %v258_v54 = vrot.slane %v243_v48, %v850_v8  ;;  %v262_v57 = vrot.slane %v243_v48, %v848_v7  ;;  %s635_s9 = sshll.u32 %s771_s8, 4  ;;  %s636_s9 = int_to_ptr.vmem [resolvable:$true] %s635_s9 }
  0x2e   :  { %v231_v58 = vrot.slane %v222_v49, %v848_v7  ;;  %v227_v59 = vrot.slane %v222_v49, %v850_v8  ;;  %vm66_vm7 = vcmask 138240   ;;  %vm439_vm8 = vcmask 588800   ;;  %s730_s10 = scalar_lea.vmem %s636_s9, 512  ;;  %p735_p2 = scmp.lt.s32.totalorder %s636_s9, %s636_s9 }
  0x2f   :  { %326 = vrot.lane.b32.xlu1 %v812_v3, %s764_s2  ;;  %324 = vrot.lane.b32.xlu0 %v806_v1, %s764_s2  ;;  %p731_p1 = scmp.ne.s32.totalorder %s636_s9, %s730_s10  ;;  %p736_p3 = scmp.lt.s32.totalorder %s730_s10, %s730_s10 }
  0x30   :  { %v235_v9 = vmul.f32 %v231_v58, %v812_v3 }
  0x31   :  { %p737_p4 = por %p736_p3, %p735_p2 }
  0x33   :  { %351 = vrot.lane.b32.xlu1 %v810_v2, %s764_s2  ;;  %349 = vrot.lane.b32.xlu0 %v804_v0, %s764_s2  ;;  %p738_p5 = pnand %p737_p4, %p731_p1 }
  0x37   :  { %286 = vrot.lane.b32.xlu1 %v812_v3, %s765_s30  ;;  %284 = vrot.lane.b32.xlu0 %v806_v1, %s765_s30 }
  0x3b   :  { %311 = vrot.lane.b32.xlu1 %v810_v2, %s765_s30  ;;  %309 = vrot.lane.b32.xlu0 %v804_v0, %s765_s30 }
  0x3f   :  { %246 = vrot.lane.b32.xlu1 %v812_v3, %s766_s4  ;;  %244 = vrot.lane.b32.xlu0 %v806_v1, %s766_s4 }
  0x43   :  { %271 = vrot.lane.b32.xlu1 %v810_v2, %s766_s4  ;;  %269 = vrot.lane.b32.xlu0 %v804_v0, %s766_s4 }
  0x47   :  { %186 = vrot.lane.b32.xlu1 %v806_v1, %s767_s5  ;;  %183 = vrot.lane.b32.xlu0 %v812_v3, %s767_s5 }
  0x4b   :  { %211 = vrot.lane.b32.xlu1 %v804_v0, %s767_s5  ;;  %208 = vrot.lane.b32.xlu0 %v810_v2, %s767_s5 }
  0x4f   :  { %146 = vrot.lane.b32.xlu1 %v806_v1, %s768_s6  ;;  %143 = vrot.lane.b32.xlu0 %v812_v3, %s768_s6 }
  0x53   :  { %171 = vrot.lane.b32.xlu1 %v804_v0, %s768_s6  ;;  %168 = vrot.lane.b32.xlu0 %v810_v2, %s768_s6 }
  0x57   :  { %106 = vrot.lane.b32.xlu1 %v806_v1, %s759_s21  ;;  %103 = vrot.lane.b32.xlu0 %v812_v3, %s759_s21 }
  0x5b   :  { %131 = vrot.lane.b32.xlu1 %v804_v0, %s759_s21  ;;  %128 = vrot.lane.b32.xlu0 %v810_v2, %s759_s21 }
  0x5f   :  { %64 = vrot.lane.b32.xlu1 %v806_v1, %s770_s7  ;;  %60 = vrot.lane.b32.xlu0 %v812_v3, %s770_s7 }
  0x63   :  { %91 = vrot.lane.b32.xlu1 %v804_v0, %s770_s7  ;;  %87 = vrot.lane.b32.xlu0 %v810_v2, %s770_s7 }
  0x99   :  { %v390_v10 = vpop.permute.xlu1 %389  ;;  %v365_v11 = vpop.permute.xlu0 %364 }
  0x9d   :  { %v392_v15 = vpop.permute.xlu1 %391  ;;  %v367_v16 = vpop.permute.xlu0 %366 }
  0x9e   :  { %v393_v19 = vsel %vm368_vm0, %v390_v10, %v392_v15  ;;  %v369_v20 = vsel %vm368_vm0, %v365_v11, %v367_v16  ;;  %v397_v21 = vsel %vm368_vm0, %v392_v15, %v390_v10  ;;  %v373_v22 = vsel %vm368_vm0, %v367_v16, %v365_v11 }
  0x9f   :  { %v399_v23 = vmul.f32 %v397_v21, %v382_v13  ;;  %v386_v24 = vmul.f32 %v382_v13, %v373_v22  ;;  %v385_v25 = vmul.f32 %v378_v14, %v369_v20  ;;  %v398_v26 = vmul.f32 %v393_v19, %v378_v14 }
  0xa0   :  { %v234_v10 = vmul.f32 %v227_v59, %v806_v1  ;;  %v197_v15 = vrot.slane %v182_v6, %v850_v8  ;;  %v239_v19 = vmul.f32 %v231_v58, %v810_v2  ;;  %v238_v20 = vmul.f32 %v227_v59, %v804_v0 }
  0xa1   :  { %528 = vmatprep.subr.mxu1 %v399_v23  ;;  %v327_v27 = vpop.permute.xlu1 %326  ;;  %457 = vmatprep.subr.mxu0 %v386_v24  ;;  %v325_v28 = vpop.permute.xlu0 %324 }
  0xa2   :  { %v329_v29 = vsel %vm328_vm1, %v325_v28, %v327_v27  ;;  %v333_v30 = vsel %vm328_vm1, %v327_v27, %v325_v28  ;;  %458 = vmatpush1.msra.mxu0 %v385_v25  ;;  %529 = vmatpush1.msra.mxu1 %v398_v26  ;;  %v142_v27 = vld [vmem:[#allocation8 + $0x4] sm:$0x3] }
  0xa3   :  { %v345_v31 = vmul.f32 %v338_v17, %v329_v29  ;;  %v346_v32 = vmul.f32 %v342_v18, %v333_v30 }
  0xa5   :  { %v352_v34 = vpop.permute.xlu1 %351  ;;  %459 = vmatprep.subr.mxu0 %v346_v32  ;;  %v350_v35 = vpop.permute.xlu0 %349 }
  0xa6   :  { %v353_v36 = vsel %vm328_vm1, %v350_v35, %v352_v34  ;;  %v357_v37 = vsel %vm328_vm1, %v352_v34, %v350_v35  ;;  %460 = vmatpush1.msra.mxu0 %v345_v31  ;;  %v157_v34 = vrot.slane %v142_v27, %v850_v8  ;;  %v161_v35 = vrot.slane %v142_v27, %v848_v7 }
  0xa7   :  { %v358_v38 = vmul.f32 %v353_v36, %v338_v17  ;;  %v359_v39 = vmul.f32 %v357_v37, %v342_v18  ;;  %v201_v18 = vrot.slane %v182_v6, %v848_v7 }
  0xa9   :  { %v287_v42 = vpop.permute.xlu1 %286  ;;  %530 = vmatprep.subr.mxu1 %v359_v39  ;;  %v285_v43 = vpop.permute.xlu0 %284 }
  0xaa   :  { %v289_v44 = vsel %vm288_vm2, %v285_v43, %v287_v42  ;;  %v293_v45 = vsel %vm288_vm2, %v287_v42, %v285_v43  ;;  %531 = vmatpush1.msra.mxu1 %v358_v38  ;;  %v102_v42 = vld [vmem:[#allocation8 + $0x2] sm:$0x3] }
  0xab   :  { %v305_v46 = vmul.f32 %v298_v40, %v289_v44  ;;  %v306_v47 = vmul.f32 %v302_v41, %v293_v45  ;;  %v117_v49 = vrot.slane %v102_v42, %v850_v8 }
  0xad   :  { %v312_v50 = vpop.permute.xlu1 %311  ;;  %461 = vmatprep.subr.mxu0 %v306_v47  ;;  %v310_v51 = vpop.permute.xlu0 %309 }
  0xae   :  { %v313_v52 = vsel %vm288_vm2, %v310_v51, %v312_v50  ;;  %v317_v53 = vsel %vm288_vm2, %v312_v50, %v310_v51  ;;  %462 = vmatpush1.msra.mxu0 %v305_v46  ;;  %v121_v50 = vrot.slane %v102_v42, %v848_v7 }
  0xaf   :  { %v318_v55 = vmul.f32 %v313_v52, %v298_v40  ;;  %v319_v56 = vmul.f32 %v317_v53, %v302_v41 }
  0xb1   :  { %v247_v60 = vpop.permute.xlu1 %246  ;;  %532 = vmatprep.subr.mxu1 %v319_v56  ;;  %v245_v61 = vpop.permute.xlu0 %244 }
  0xb2   :  { %v249_v62 = vsel %vm248_vm3, %v245_v61, %v247_v60  ;;  %v253_v63 = vsel %vm248_vm3, %v247_v60, %v245_v61  ;;  %533 = vmatpush1.msra.mxu1 %v318_v55 }
  0xb3   :  { %v265_v4 = vmul.f32 %v258_v54, %v249_v62  ;;  %v266_v5 = vmul.f32 %v262_v57, %v253_v63 }
  0xb5   :  { %v272_v11 = vpop.permute.xlu1 %271  ;;  %463 = vmatprep.subr.mxu0 %v266_v5  ;;  %v270_v12 = vpop.permute.xlu0 %269 }
  0xb6   :  { %v273_v13 = vsel %vm248_vm3, %v270_v12, %v272_v11  ;;  %v277_v14 = vsel %vm248_vm3, %v272_v11, %v270_v12  ;;  %464 = vmatpush1.msra.mxu0 %v265_v4 }
  0xb7   :  { %v278_v16 = vmul.f32 %v273_v13, %v258_v54  ;;  %v279_v17 = vmul.f32 %v277_v14, %v262_v57  ;;  %465 = vmatprep.subr.mxu0 %v235_v9  ;;  %v58_v57 = vld [vmem:[#allocation8] sm:$0x3]  ;;  %v402_v14 = vld [vmem:[#allocation6] sm:$0xff] }
  0xb8   :  { %466 = vmatpush1.msra.mxu0 %v234_v10  ;;  %v75_v4 = vrot.slane %v58_v57, %v850_v8  ;;  %v79_v5 = vrot.slane %v58_v57, %v848_v7 }
  0xb9   :  { %v187_v21 = vpop.permute.xlu1 %186  ;;  %534 = vmatprep.subr.mxu1 %v279_v17  ;;  %v184_v22 = vpop.permute.xlu0 %183 }
  0xba   :  { %v189_v23 = vsel %vm188_vm4, %v187_v21, %v184_v22  ;;  %v192_v24 = vsel %vm188_vm4, %v184_v22, %v187_v21  ;;  %535 = vmatpush1.msra.mxu1 %v278_v16 }
  0xbb   :  { %v204_v25 = vmul.f32 %v197_v15, %v192_v24  ;;  %v205_v26 = vmul.f32 %v201_v18, %v189_v23  ;;  %536 = vmatprep.subr.mxu1 %v239_v19 }
  0xbc   :  { %537 = vmatpush1.msra.mxu1 %v238_v20 }
  0xbd   :  { %v212_v28 = vpop.permute.xlu1 %211  ;;  %v209_v29 = vpop.permute.xlu0 %208  ;;  %467 = vmatprep.subr.mxu0 %v205_v26 }
  0xbe   :  { %v213_v30 = vsel %vm188_vm4, %v212_v28, %v209_v29  ;;  %v216_v31 = vsel %vm188_vm4, %v209_v29, %v212_v28  ;;  %468 = vmatpush1.msra.mxu0 %v204_v25 }
  0xbf   :  { %v217_v32 = vmul.f32 %v216_v31, %v197_v15  ;;  %v218_v33 = vmul.f32 %v213_v30, %v201_v18 }
  0xc1   :  { %v147_v36 = vpop.permute.xlu1 %146  ;;  %538 = vmatprep.subr.mxu1 %v218_v33  ;;  %v144_v37 = vpop.permute.xlu0 %143 }
  0xc2   :  { %v149_v38 = vsel %vm148_vm5, %v147_v36, %v144_v37  ;;  %v152_v39 = vsel %vm148_vm5, %v144_v37, %v147_v36  ;;  %539 = vmatpush1.msra.mxu1 %v217_v32 }
  0xc3   :  { %v164_v40 = vmul.f32 %v157_v34, %v152_v39  ;;  %v165_v41 = vmul.f32 %v161_v35, %v149_v38 }
  0xc5   :  { %v172_v43 = vpop.permute.xlu1 %171  ;;  %v169_v44 = vpop.permute.xlu0 %168  ;;  %469 = vmatprep.subr.mxu0 %v165_v41 }
  0xc6   :  { %v173_v45 = vsel %vm148_vm5, %v172_v43, %v169_v44  ;;  %v176_v46 = vsel %vm148_vm5, %v169_v44, %v172_v43  ;;  %470 = vmatpush1.msra.mxu0 %v164_v40 }
  0xc7   :  { %v177_v47 = vmul.f32 %v176_v46, %v157_v34  ;;  %v178_v48 = vmul.f32 %v173_v45, %v161_v35 }
  0xc9   :  { %v107_v51 = vpop.permute.xlu1 %106  ;;  %540 = vmatprep.subr.mxu1 %v178_v48  ;;  %v104_v52 = vpop.permute.xlu0 %103 }
  0xca   :  { %v109_v53 = vsel %vm108_vm6, %v107_v51, %v104_v52  ;;  %v112_v54 = vsel %vm108_vm6, %v104_v52, %v107_v51  ;;  %541 = vmatpush1.msra.mxu1 %v177_v47 }
  0xcb   :  { %v124_v55 = vmul.f32 %v117_v49, %v112_v54  ;;  %v125_v56 = vmul.f32 %v121_v50, %v109_v53 }
  0xcd   :  { %v132_v58 = vpop.permute.xlu1 %131  ;;  %v129_v59 = vpop.permute.xlu0 %128  ;;  %471 = vmatprep.subr.mxu0 %v125_v56 }
  0xce   :  { %v133_v60 = vsel %vm108_vm6, %v132_v58, %v129_v59  ;;  %v136_v61 = vsel %vm108_vm6, %v129_v59, %v132_v58  ;;  %472 = vmatpush1.msra.mxu0 %v124_v55 }
  0xcf   :  { %v137_v62 = vmul.f32 %v136_v61, %v117_v49  ;;  %v138_v63 = vmul.f32 %v133_v60, %v121_v50 }
  0xd1   :  { %v65_v6 = vpop.permute.xlu1 %64  ;;  %542 = vmatprep.subr.mxu1 %v138_v63  ;;  %v61_v9 = vpop.permute.xlu0 %60 }
  0xd2   :  { %v67_v10 = vsel %vm66_vm7, %v65_v6, %v61_v9  ;;  %v70_v11 = vsel %vm66_vm7, %v61_v9, %v65_v6  ;;  %543 = vmatpush1.msra.mxu1 %v137_v62 }
  0xd3   :  { %v82_v12 = vmul.f32 %v75_v4, %v70_v11  ;;  %v83_v13 = vmul.f32 %v79_v5, %v67_v10 }
  0xd5   :  { %v92_v15 = vpop.permute.xlu1 %91  ;;  %v88_v16 = vpop.permute.xlu0 %87  ;;  %473 = vmatprep.subr.mxu0 %v83_v13 }
  0xd6   :  { %v93_v17 = vsel %vm66_vm7, %v92_v15, %v88_v16  ;;  %v96_v8 = vsel %vm66_vm7, %v88_v16, %v92_v15  ;;  %474 = vmatpush1.msra.mxu0 %v82_v12 }
  0xd7   :  { %v97_v7 = vmul.f32 %v96_v8, %v75_v4  ;;  %v98_v18 = vmul.f32 %v93_v17, %v79_v5  ;;  %648 = vmatmul.mubr.msk.f32.vlgmr.msra.gmra.mxu0 %vm439_vm8, %v402_v14 }
  0xd9   :  { %544 = vmatprep.subr.mxu1 %v98_v18 }
  0xda   :  { %545 = vmatpush1.msra.mxu1 %v97_v7 }
  0xdb   :  { %649 = vmatmul.mubr.msk.f32.vlgmr.msra.gmra.mxu1 %vm439_vm8, %v402_v14 }
 0x197   :  { %v509_v19 = vpop.f32.mrf.mxu0 }
 0x199   :  { %v511_v20 = vpop.f32.mrf.mxu0 }
 0x19a   :  { %v585_v21 = vadd.f32 %v511_v20, %v509_v19 }
 0x19b   :  { %v580_v22 = vpop.f32.mrf.mxu1 }
 0x19c   :  { %586 = vadd.xlane.f32.xlu0 %v585_v21 }
 0x19d   :  { %v582_v23 = vpop.f32.mrf.mxu1 }
 0x19e   :  { %v607_v24 = vadd.f32 %v582_v23, %v580_v22 }
 0x1a0   :  { %608 = vadd.xlane.f32.xlu1 %v607_v24 }
 0x225   :  { %v587_v25 = vpop.xlane.xlu0 %586 }
 0x226   :  { %v588_v26 = vmul.f32 0.00390625, %v587_v25 }
 0x228   :  { %v589_v27 = vsub.f32 %v509_v19, %v588_v26  ;;  %v590_v28 = vsub.f32 %v511_v20, %v588_v26 }
 0x229   :  { %v609_v29 = vpop.xlane.xlu1 %608 }
 0x22a   :  { %v610_v30 = vmul.f32 0.00390625, %v609_v29  ;;  %v591_v31 = vmul.f32 %v589_v27, %v589_v27  ;;  %v592_v32 = vmul.f32 %v590_v28, %v590_v28 }
 0x22c   :  { %v611_v33 = vsub.f32 %v580_v22, %v610_v30  ;;  %v612_v34 = vsub.f32 %v582_v23, %v610_v30  ;;  %v593_v35 = vadd.f32 %v592_v32, %v591_v31 }
 0x22e   :  { %594 = vadd.xlane.f32.xlu0 %v593_v35  ;;  %v613_v36 = vmul.f32 %v611_v33, %v611_v33  ;;  %v614_v37 = vmul.f32 %v612_v34, %v612_v34 }
 0x230   :  { %v615_v38 = vadd.f32 %v614_v37, %v613_v36 }
 0x232   :  { %616 = vadd.xlane.f32.xlu0 %v615_v38 }
 0x2b7   :  { %v595_v39 = vpop.xlane.xlu0 %594 }
 0x2b8   :  { %v596_v40 = vmul.f32 0.00390625, %v595_v39 }
 0x2ba   :  { %v597_v41 = vadd.f32 1e-05, %v596_v40 }
 0x2bb   :  { %v617_v42 = vpop.xlane.xlu0 %616 }
 0x2bc   :  { %666 = vrsqrt.f32 %v597_v41  ;;  %v618_v43 = vmul.f32 0.00390625, %v617_v42 }
 0x2be   :  { %v619_v44 = vadd.f32 1e-05, %v618_v43 }
 0x2c0   :  { %668 = vrsqrt.f32 %v619_v44 }
 0x2c9   :  { %v667_v45 = vpop.eup %666 }
 0x2ca   :  { %v599_v46 = vmul.f32 %v667_v45, %v589_v27  ;;  %v600_v47 = vmul.f32 %v667_v45, %v590_v28 }
 0x2cc   :  { %v601_v48 = vmax.f32 %v599_v46, 0.0  ;;  %v602_v49 = vmax.f32 %v600_v47, 0.0 }
 0x2cd   :  { %v669_v50 = vpop.eup %668 }
 0x2ce   :  { %v603_v51 = vadd.f32 %v601_v48, %v806_v1  ;;  %v604_v52 = vadd.f32 %v602_v49, %v812_v3  ;;  %v621_v53 = vmul.f32 %v669_v50, %v611_v33  ;;  %v622_v54 = vmul.f32 %v669_v50, %v612_v34 }
 0x2d0   :  { %605 = vst [vmem:[#allocation9] sm:$0xff] %v603_v51  ;;  %606 = vst [vmem:[#allocation9 + $0x8] sm:$0xff] %v604_v52  ;;  %v623_v55 = vmax.f32 %v621_v53, 0.0  ;;  %v624_v56 = vmax.f32 %v622_v54, 0.0 }
 0x2d2   :  { %v625_v57 = vadd.f32 %v623_v55, %v804_v0  ;;  %v626_v58 = vadd.f32 %v624_v56, %v810_v2 }
 0x2d4   :  { %628 = vst [vmem:[#allocation9 + $0x10] sm:$0xff] %v625_v57  ;;  %629 = vst [vmem:[#allocation9 + $0x18] sm:$0xff] %v626_v58 }
 0x2d5   :  { %741 = shalt.err (!%p738_p5)
}
 0x2d6   :  { %641 = dma.vmem_to_hbm [thread:$0]  %s636_s9, 512, %s915_s3, [#allocation5], %s758_s20, %s758_s20, %s759_s21  }
 0x2d7   :  { %754 = dma.done.wait [#allocation5], 512  }
 0x2d8   :  { %755 = vsyncadd [#allocation5], 4294966784 }
 0x2d9   :  { %645 = vsyncpa [#allocation4], 1 }
 0x2da   :  { %646 = vsyncpa [#allocation7], 1 }
 0x2db   :  { %647 = vsyncpa [#allocation5], 1 }

</bundles_post_ra>
